<compile_context>
chip_gen: v7x
topology: tpu7x:2x2x1
jax: 0.10.0
libtpu: 0.0.40
codegen_flags: <defaults>
</compile_context>

<pallas_src>
import functools

import jax
import jax.numpy as jnp
import numpy as np
from jax.experimental import pallas as pl
from jax.experimental.pallas import tpu as pltpu

_VMEM_BUDGET_BYTES = 40 << 20      # conservative: fits v7x's 64 MiB per-TC VMEM
_VMEM_HEADROOM_BYTES = 8 << 20
_VMEM_LIMIT_CAP_BYTES = 48 << 20   # can be raised on v5e/v6e (128 MiB physical)


def _gat_kernel(h_ref, adj_ref, w_ref, a_ref, bias_ref, out_ref, attn_ref,
                hp_sc, src_sc, dst_sc, *, n_head, f_out, tq, mm_dtype):
    """One (batch, query-row-tile) grid step.

    h_ref   : (1, n, f_in)      all node features (DMA'd only when batch changes)
    adj_ref : (1, tq, n)        adjacency rows of this query tile
    w_ref   : (f_in, H*f_out)   head-fused projection weights
    a_ref   : (H*f_out, 2*H)    block-diagonal [a_src | a_dst]
    bias_ref: (1, f_out)
    out_ref : (1, tq, H*f_out)  lane-dense packed output tile
    attn_ref: (1, H, tq, n)
    hp_sc   : (n, H*f_out)      per-batch projected features (persists over q)
    src_sc  : (n, H)            per-batch source scores      (persists over q)
    dst_sc  : (H, n)            per-batch dest scores, pre-transposed
    """
    q = pl.program_id(1)

    # ---- per-batch work, hoisted out of the query-tile sweep ----------------
    @pl.when(q == 0)
    def _():
        hp = jnp.dot(h_ref[0], w_ref[...],
                     preferred_element_type=jnp.float32)             # (n, HF)
        hp_sc[...] = hp
        scores = jnp.dot(jnp.tanh(hp), a_ref[...],
                         preferred_element_type=jnp.float32)          # (n, 2H)
        src_sc[...] = scores[:, :n_head]
        # One transpose per batch; the head loop below needs no XLU relayouts.
        dst_sc[...] = jnp.transpose(scores[:, n_head:])               # (H, n)

    # ---- per query-row-tile work --------------------------------------------
    q0 = pl.multiple_of(q * tq, tq)
    adj = adj_ref[0]                            # (tq, n)
    # PyTorch masks where (1 - adj) != 0, i.e. adj != 1.
    masked = adj != 1.0
    neg_big = jnp.float32(-1e30)                # finite: all-masked row -> uniform attn, not NaN
    src_tile = src_sc[pl.ds(q0, tq), :]         # (tq, H)
    dst_all = dst_sc[...]                       # (H, n)
    bias_row = bias_ref[...]                    # (1, f_out)

    for hd in range(n_head):                    # n_head is small and static
        logits = src_tile[:, hd:hd + 1] + dst_all[hd:hd + 1, :]      # (tq, n)
        logits = jnp.maximum(logits, 0.2 * logits)                   # LeakyReLU(0.2)
        logits = jnp.where(masked, neg_big, logits)
        m = jnp.max(logits, axis=-1, keepdims=True)
        e = jnp.exp(logits - m)
        s = jnp.sum(e, axis=-1, keepdims=True)
        attn = e * (1.0 / s)        # exact reciprocal on (tq,1) values: negligible
        attn_ref[0, hd] = attn.astype(attn_ref.dtype)
        hp_h = hp_sc[:, hd * f_out:(hd + 1) * f_out]                 # (n, f_out)
        av = jnp.dot(attn.astype(mm_dtype), hp_h.astype(mm_dtype),
                     preferred_element_type=jnp.float32)             # (tq, f_out)
        # Direct store into the lane slice of the VMEM-staged output tile
        # (replaces the old per-head list + jnp.concatenate).
        out_ref[0, :, hd * f_out:(hd + 1) * f_out] = av + bias_row


def _pick_row_tile(n, fixed_bytes, per_tile_bytes, budget_bytes, max_tq):
    """Largest query-row tile (multiple of 8 dividing n) that fits the VMEM budget."""
    cands = []
    if n <= max_tq:
        cands.append(n)
    cap = min(max_tq, n)
    cands.extend(t for t in range(cap - cap % 8, 7, -8) if n % t == 0)
    if not cands:
        # TODO(synk): ragged last tile (n > max_tq with no multiple-of-8 divisor) is not tiled.
        cands = [n]
    for tq in cands:
        if fixed_bytes + per_tile_bytes(tq) <= budget_bytes:
            return tq
    return cands[-1]


@functools.partial(jax.jit, static_argnames=("attn_dtype", "matmul_dtype", "max_tq"))
def batch_multi_head_graph_attention(h, adj, w, a_src, a_dst, bias,
                                     attn_dtype=jnp.float32,
                                     matmul_dtype=jnp.float32,
                                     max_tq=512):
    """Forward pass of BatchMultiHeadGraphAttention.

    attn_dtype  : dtype of the returned attention tensor; bfloat16 halves the
                  dominant bs*H*n^2 HBM writeback for large graphs.
    matmul_dtype: MXU operand dtype; use bfloat16 on v6e/v7x (f32 accumulation
                  is kept via preferred_element_type).  Defaults are f32 so the
                  small-shape verification below stays tight.
    """
    bs, n, f_in = h.shape
    n_head, _, f_out = w.shape
    hf = n_head * f_out

    # ---- head-fused parameter packing (once, outside the kernel) ------------
    w_fused = jnp.transpose(w, (1, 0, 2)).reshape(f_in, hf).astype(matmul_dtype)
    h_in = h.astype(matmul_dtype)
    eye = jnp.eye(n_head, dtype=jnp.float32)
    src_blk = jnp.einsum('hf,hg->hfg', a_src[:, :, 0], eye).reshape(hf, n_head)
    dst_blk = jnp.einsum('hf,hg->hfg', a_dst[:, :, 0], eye).reshape(hf, n_head)
    a_fused = jnp.concatenate([src_blk, dst_blk], axis=-1)            # (HF, 2H)
    bias_row = bias.reshape(1, f_out).astype(jnp.float32)

    # ---- VMEM-aware query-row tile -------------------------------------------
    attn_bytes = jnp.dtype(attn_dtype).itemsize
    mm_bytes = jnp.dtype(matmul_dtype).itemsize
    fixed = (n * hf * 4 + 2 * n * n_head * 4        # hp / src / dst scratch
             + 2 * n * f_in * mm_bytes              # h block (double-buffered)
             + 2 * f_in * hf * mm_bytes             # w block
             + 2 * hf * 2 * n_head * 4              # a block
             + 2 * f_out * 4)                       # bias block

    def per_tile(tq):
        return (2 * n_head * tq * n * attn_bytes    # attn out block (double-buffered)
                + 2 * tq * n * 4                    # adj block
                + 2 * tq * hf * 4)                  # packed out block

    tq = _pick_row_tile(n, fixed, per_tile, _VMEM_BUDGET_BYTES, max_tq)
    n_qt = n // tq
    vmem_limit = int(min(max(fixed + per_tile(tq) + _VMEM_HEADROOM_BYTES, 32 << 20),
                         _VMEM_LIMIT_CAP_BYTES))

    out_shapes = (
        jax.ShapeDtypeStruct((bs, n, hf), jnp.float32),        # packed output
        jax.ShapeDtypeStruct((bs, n_head, n, n), attn_dtype),  # attention
    )

    grid_spec = pltpu.PrefetchScalarGridSpec(
        num_scalar_prefetch=0,
        grid=(bs, n_qt),       # q innermost: per-batch scratch reused across tiles
        in_specs=[
            pl.BlockSpec((1, n, f_in), lambda b, q: (b, 0, 0)),       # h (all nodes)
            pl.BlockSpec((1, tq, n), lambda b, q: (b, q, 0)),         # adj rows
            pl.BlockSpec((f_in, hf), lambda b, q: (0, 0)),            # w fused
            pl.BlockSpec((hf, 2 * n_head), lambda b, q: (0, 0)),      # a fused
            pl.BlockSpec((1, f_out), lambda b, q: (0, 0)),            # bias
        ],
        out_specs=[
            pl.BlockSpec((1, tq, hf), lambda b, q: (b, q, 0)),
            pl.BlockSpec((1, n_head, tq, n), lambda b, q: (b, 0, q, 0)),
        ],
        scratch_shapes=[
            pltpu.VMEM((n, hf), jnp.float32),       # hp_sc
            pltpu.VMEM((n, n_head), jnp.float32),   # src_sc
            pltpu.VMEM((n_head, n), jnp.float32),   # dst_sc
        ],
    )

    out_packed, attn = pl.pallas_call(
        functools.partial(_gat_kernel, n_head=n_head, f_out=f_out, tq=tq,
                          mm_dtype=matmul_dtype),
        out_shape=out_shapes,
        grid_spec=grid_spec,
        compiler_params=pltpu.CompilerParams(
            # batch is sharded over v7x's 2 TensorCores; q must stay sequential
            # because the per-batch scratches are reused across the q sweep.
            dimension_semantics=("parallel", "arbitrary"),
            vmem_limit_bytes=vmem_limit),
    )(h_in, adj, w_fused, a_fused, bias_row)

    out = out_packed.reshape(bs, n, n_head, f_out).transpose(0, 2, 1, 3)
    return out, attn


def _reference(h, adj, w, a_src, a_dst, bias):
    # Pure-JAX reference mirroring the torch forward.
    h_prime = jnp.einsum('bnf,hfo->bhno', h, w)                 # (bs, H, n, f_out)
    t = jnp.tanh(h_prime)
    attn_src = jnp.einsum('bhno,hoe->bhne', t, a_src)           # (bs, H, n, 1)
    attn_dst = jnp.einsum('bhno,hoe->bhne', t, a_dst)           # (bs, H, n, 1)
    attn = attn_src + jnp.swapaxes(attn_dst, -1, -2)            # (bs, H, n, n)
    attn = jnp.where(attn >= 0, attn, 0.2 * attn)
    mask = (1.0 - adj[:, None, :, :]) != 0
    attn = jnp.where(mask, -jnp.inf, attn)
    attn = jax.nn.softmax(attn, axis=-1)
    out = jnp.einsum('bhnm,bhmo->bhno', attn, h_prime) + bias
    return out, attn


def _xavier_uniform(key, shape):
    fan_in, fan_out = shape[-2], shape[-1]
    limit = float(np.sqrt(6.0 / (fan_in + fan_out)))
    return jax.random.uniform(key, shape, jnp.float32, -limit, limit)


if __name__ == "__main__":
    key = jax.random.PRNGKey(0)
    k_h, k_adj, k_w, k_as, k_ad = jax.random.split(key, 5)

    bs, n, f_in, f_out, n_head = 2, 8, 16, 32, 4

    h = jax.random.normal(k_h, (bs, n, f_in), jnp.float32)
    # random 0/1 adjacency with self-loops (no fully-masked softmax rows)
    adj = (jax.random.uniform(k_adj, (bs, n, n)) > 0.5).astype(jnp.float32)
    adj = jnp.maximum(adj, jnp.eye(n, dtype=jnp.float32)[None])

    w = _xavier_uniform(k_w, (n_head, f_in, f_out))
    a_src = _xavier_uniform(k_as, (n_head, f_out, 1))
    a_dst = _xavier_uniform(k_ad, (n_head, f_out, 1))
    bias = jnp.zeros((f_out,), jnp.float32)   # init.constant_(bias, 0)

    out, attn = batch_multi_head_graph_attention(h, adj, w, a_src, a_dst, bias)
    jax.block_until_ready((out, attn))

    out_ref, attn_ref = _reference(h, adj, w, a_src, a_dst, bias)
    # Small tolerance only for MXU-vs-XLA f32 matmul rounding differences
    # (softmax normalization is now an exact reciprocal).
    np.testing.assert_allclose(np.asarray(attn), np.asarray(attn_ref),
                               rtol=2e-3, atol=2e-3)
    np.testing.assert_allclose(np.asarray(out), np.asarray(out_ref),
                               rtol=2e-3, atol=2e-3)

    print("KERNEL_OK")
</pallas_src>

<mosaic_0001>
module attributes {stable_mosaic.version = 11 : i64} {
  func.func @_gat_kernel(%arg0: i32, %arg1: i32, %arg2: memref<1x8x16xf32, #tpu.memory_space<vmem>>, %arg3: memref<1x8x8xf32, #tpu.memory_space<vmem>>, %arg4: memref<16x128xf32, #tpu.memory_space<vmem>>, %arg5: memref<128x8xf32, #tpu.memory_space<vmem>>, %arg6: memref<1x32xf32, #tpu.memory_space<vmem>>, %arg7: memref<1x8x128xf32, #tpu.memory_space<vmem>>, %arg8: memref<1x4x8x8xf32, #tpu.memory_space<vmem>>, %arg9: memref<8x128xf32, #tpu.memory_space<vmem>>, %arg10: memref<8x4xf32, #tpu.memory_space<vmem>>, %arg11: memref<4x8xf32, #tpu.memory_space<vmem>>) attributes {dimension_semantics = [#tpu.dimension_semantics<parallel>, #tpu.dimension_semantics<arbitrary>], iteration_bounds = array<i64: 2, 1>, scalar_prefetch = 0 : i64, scratch_operands = 3 : i64, tpu.core_type = #tpu.core_type<tc>, window_params = [{transform_indices = @transform_0, window_bounds = array<i64: 1, 8, 16>}, {transform_indices = @transform_1, window_bounds = array<i64: 1, 8, 8>}, {pipeline_mode = #tpu.pipeline_mode<synchronous>, transform_indices = @transform_2, window_bounds = array<i64: 16, 128>}, {pipeline_mode = #tpu.pipeline_mode<synchronous>, transform_indices = @transform_3, window_bounds = array<i64: 128, 8>}, {pipeline_mode = #tpu.pipeline_mode<synchronous>, transform_indices = @transform_4, window_bounds = array<i64: 1, 32>}, {transform_indices = @transform_5, window_bounds = array<i64: 1, 8, 128>}, {transform_indices = @transform_6, window_bounds = array<i64: 1, 4, 8, 8>}]} {
    %c0_i32 = arith.constant 0 : i32
    %0 = arith.cmpi eq, %arg1, %c0_i32 : i32
    %1 = arith.extui %0 : i1 to i32
    %c0_i32_0 = arith.constant 0 : i32
    %2 = arith.cmpi ne, %1, %c0_i32_0 : i32
    scf.if %2 {
      %c0_62 = arith.constant 0 : index
      %c0_63 = arith.constant 0 : index
      %c0_64 = arith.constant 0 : index
      %137 = vector.load %arg2[%c0_62, %c0_63, %c0_64] : memref<1x8x16xf32, #tpu.memory_space<vmem>>, vector<1x8x16xf32>
      %138 = vector.shape_cast %137 : vector<1x8x16xf32> to vector<8x16xf32>
      %c0_65 = arith.constant 0 : index
      %c0_66 = arith.constant 0 : index
      %139 = vector.load %arg4[%c0_65, %c0_66] : memref<16x128xf32, #tpu.memory_space<vmem>>, vector<16x128xf32>
      %cst_67 = arith.constant dense<0.000000e+00> : vector<8x128xf32>
      %140 = tpu.matmul %138, %139, %cst_67 {dimension_numbers = #tpu.dot_dimension_numbers<[1], [0], [0], [1], [0, 0, 1, 1], [], []>} : vector<8x16xf32>, vector<16x128xf32>, vector<8x128xf32> -> vector<8x128xf32>
      %c0_68 = arith.constant 0 : index
      %c0_69 = arith.constant 0 : index
      %141 = vector.load %arg9[%c0_68, %c0_69] : memref<8x128xf32, #tpu.memory_space<vmem>>, vector<8x128xf32>
      tpu.vector_store %arg9[%c0_68, %c0_69], %140 {strides = array<i32>} : memref<8x128xf32, #tpu.memory_space<vmem>>, vector<8x128xf32>,
      %142 = math.tanh %140 : vector<8x128xf32>
      %c0_70 = arith.constant 0 : index
      %c0_71 = arith.constant 0 : index
      %143 = vector.load %arg5[%c0_70, %c0_71] : memref<128x8xf32, #tpu.memory_space<vmem>>, vector<128x8xf32>
      %cst_72 = arith.constant dense<0.000000e+00> : vector<8x8xf32>
      %144 = tpu.matmul %142, %143, %cst_72 {dimension_numbers = #tpu.dot_dimension_numbers<[1], [0], [0], [1], [0, 0, 1, 1], [], []>} : vector<8x128xf32>, vector<128x8xf32>, vector<8x8xf32> -> vector<8x8xf32>
      %145 = vector.extract_strided_slice %144 {offsets = [0, 0], sizes = [8, 4], strides = [1, 1]} : vector<8x8xf32> to vector<8x4xf32>
      %c0_73 = arith.constant 0 : index
      %c0_74 = arith.constant 0 : index
      %146 = vector.load %arg10[%c0_73, %c0_74] : memref<8x4xf32, #tpu.memory_space<vmem>>, vector<8x4xf32>
      tpu.vector_store %arg10[%c0_73, %c0_74], %145 {strides = array<i32>} : memref<8x4xf32, #tpu.memory_space<vmem>>, vector<8x4xf32>,
      %147 = vector.extract_strided_slice %144 {offsets = [0, 4], sizes = [8, 4], strides = [1, 1]} : vector<8x8xf32> to vector<8x4xf32>
      %148 = tpu.transpose %147, [1, 0] : vector<8x4xf32> -> vector<4x8xf32>
      %c0_75 = arith.constant 0 : index
      %c0_76 = arith.constant 0 : index
      %149 = vector.load %arg11[%c0_75, %c0_76] : memref<4x8xf32, #tpu.memory_space<vmem>>, vector<4x8xf32>
      tpu.vector_store %arg11[%c0_75, %c0_76], %148 {strides = array<i32>} : memref<4x8xf32, #tpu.memory_space<vmem>>, vector<4x8xf32>,
    } else {
    }
    %c8_i32 = arith.constant 8 : i32
    %3 = arith.muli %arg1, %c8_i32 : i32
    %4 = tpu.assume_multiple %3, 8 : i32
    %c0 = arith.constant 0 : index
    %c0_1 = arith.constant 0 : index
    %c0_2 = arith.constant 0 : index
    %5 = vector.load %arg3[%c0, %c0_1, %c0_2] : memref<1x8x8xf32, #tpu.memory_space<vmem>>, vector<1x8x8xf32>
    %6 = vector.shape_cast %5 : vector<1x8x8xf32> to vector<8x8xf32>
    %cst = arith.constant 1.000000e+00 : f32
    %7 = vector.broadcast %cst : f32 to vector<8x8xf32>
    %8 = arith.cmpf one, %6, %7 : vector<8x8xf32>
    %9 = arith.index_cast %4 : i32 to index
    %c0_3 = arith.constant 0 : index
    %10 = vector.load %arg10[%9, %c0_3] : memref<8x4xf32, #tpu.memory_space<vmem>>, vector<8x4xf32>
    %c0_4 = arith.constant 0 : index
    %c0_5 = arith.constant 0 : index
    %11 = vector.load %arg11[%c0_4, %c0_5] : memref<4x8xf32, #tpu.memory_space<vmem>>, vector<4x8xf32>
    %c0_6 = arith.constant 0 : index
    %c0_7 = arith.constant 0 : index
    %12 = vector.load %arg6[%c0_6, %c0_7] : memref<1x32xf32, #tpu.memory_space<vmem>>, vector<1x32xf32>
    %13 = vector.extract_strided_slice %10 {offsets = [0, 0], sizes = [8, 1], strides = [1, 1]} : vector<8x4xf32> to vector<8x1xf32>
    %14 = vector.extract_strided_slice %11 {offsets = [0, 0], sizes = [1, 8], strides = [1, 1]} : vector<4x8xf32> to vector<1x8xf32>
    %15 = vector.broadcast %13 : vector<8x1xf32> to vector<8x8xf32>
    %16 = vector.broadcast %14 : vector<1x8xf32> to vector<8x8xf32>
    %17 = arith.addf %15, %16 : vector<8x8xf32>
    %cst_8 = arith.constant 2.000000e-01 : f32
    %18 = vector.broadcast %cst_8 : f32 to vector<8x8xf32>
    %19 = arith.mulf %18, %17 : vector<8x8xf32>
    %20 = arith.maximumf %17, %19 : vector<8x8xf32>
    %cst_9 = arith.constant -1.000000e+30 : f32
    %21 = vector.broadcast %cst_9 : f32 to vector<8x8xf32>
    %22 = arith.select %8, %21, %20 : vector<8x8xi1>, vector<8x8xf32>
    %cst_10 = arith.constant dense<0xFF800000> : vector<8xf32>
    %23 = vector.multi_reduction <maximumf>, %22, %cst_10 [1] : vector<8x8xf32> to vector<8xf32>
    %24 = vector.shape_cast %23 : vector<8xf32> to vector<8x1xf32>
    %25 = vector.broadcast %24 : vector<8x1xf32> to vector<8x8xf32>
    %26 = arith.subf %22, %25 : vector<8x8xf32>
    %27 = math.exp %26 : vector<8x8xf32>
    %cst_11 = arith.constant dense<0.000000e+00> : vector<8xf32>
    %28 = vector.multi_reduction <add>, %27, %cst_11 [1] : vector<8x8xf32> to vector<8xf32>
    %29 = vector.shape_cast %28 : vector<8xf32> to vector<8x1xf32>
    %cst_12 = arith.constant 1.000000e+00 : f32
    %30 = vector.broadcast %cst_12 : f32 to vector<8x1xf32>
    %31 = arith.divf %30, %29 : vector<8x1xf32>
    %32 = vector.broadcast %31 : vector<8x1xf32> to vector<8x8xf32>
    %33 = arith.mulf %27, %32 : vector<8x8xf32>
    %c0_13 = arith.constant 0 : index
    %c0_14 = arith.constant 0 : index
    %c0_15 = arith.constant 0 : index
    %c0_16 = arith.constant 0 : index
    %34 = vector.load %arg8[%c0_13, %c0_14, %c0_15, %c0_16] : memref<1x4x8x8xf32, #tpu.memory_space<vmem>>, vector<1x1x8x8xf32>
    %35 = vector.shape_cast %34 : vector<1x1x8x8xf32> to vector<8x8xf32>
    %36 = vector.shape_cast %33 : vector<8x8xf32> to vector<1x1x8x8xf32>
    tpu.vector_store %arg8[%c0_13, %c0_14, %c0_15, %c0_16], %36 {strides = array<i32>} : memref<1x4x8x8xf32, #tpu.memory_space<vmem>>, vector<1x1x8x8xf32>,
    %c0_17 = arith.constant 0 : index
    %c0_18 = arith.constant 0 : index
    %37 = vector.load %arg9[%c0_17, %c0_18] : memref<8x128xf32, #tpu.memory_space<vmem>>, vector<8x32xf32>
    %cst_19 = arith.constant dense<0.000000e+00> : vector<8x32xf32>
    %38 = tpu.matmul %33, %37, %cst_19 {dimension_numbers = #tpu.dot_dimension_numbers<[1], [0], [0], [1], [0, 0, 1, 1], [], []>} : vector<8x8xf32>, vector<8x32xf32>, vector<8x32xf32> -> vector<8x32xf32>
    %39 = vector.broadcast %12 : vector<1x32xf32> to vector<8x32xf32>
    %40 = arith.addf %38, %39 : vector<8x32xf32>
    %c0_20 = arith.constant 0 : index
    %c0_21 = arith.constant 0 : index
    %c0_22 = arith.constant 0 : index
    %41 = vector.load %arg7[%c0_20, %c0_21, %c0_22] : memref<1x8x128xf32, #tpu.memory_space<vmem>>, vector<1x8x32xf32>
    %42 = vector.shape_cast %41 : vector<1x8x32xf32> to vector<8x32xf32>
    %43 = vector.shape_cast %40 : vector<8x32xf32> to vector<1x8x32xf32>
    tpu.vector_store %arg7[%c0_20, %c0_21, %c0_22], %43 {strides = array<i32>} : memref<1x8x128xf32, #tpu.memory_space<vmem>>, vector<1x8x32xf32>,
    %44 = vector.extract_strided_slice %10 {offsets = [0, 1], sizes = [8, 1], strides = [1, 1]} : vector<8x4xf32> to vector<8x1xf32>
    %45 = vector.extract_strided_slice %11 {offsets = [1, 0], sizes = [1, 8], strides = [1, 1]} : vector<4x8xf32> to vector<1x8xf32>
    %46 = vector.broadcast %44 : vector<8x1xf32> to vector<8x8xf32>
    %47 = vector.broadcast %45 : vector<1x8xf32> to vector<8x8xf32>
    %48 = arith.addf %46, %47 : vector<8x8xf32>
    %cst_23 = arith.constant 2.000000e-01 : f32
    %49 = vector.broadcast %cst_23 : f32 to vector<8x8xf32>
    %50 = arith.mulf %49, %48 : vector<8x8xf32>
    %51 = arith.maximumf %48, %50 : vector<8x8xf32>
    %cst_24 = arith.constant -1.000000e+30 : f32
    %52 = vector.broadcast %cst_24 : f32 to vector<8x8xf32>
    %53 = arith.select %8, %52, %51 : vector<8x8xi1>, vector<8x8xf32>
    %cst_25 = arith.constant dense<0xFF800000> : vector<8xf32>
    %54 = vector.multi_reduction <maximumf>, %53, %cst_25 [1] : vector<8x8xf32> to vector<8xf32>
    %55 = vector.shape_cast %54 : vector<8xf32> to vector<8x1xf32>
    %56 = vector.broadcast %55 : vector<8x1xf32> to vector<8x8xf32>
    %57 = arith.subf %53, %56 : vector<8x8xf32>
    %58 = math.exp %57 : vector<8x8xf32>
    %cst_26 = arith.constant dense<0.000000e+00> : vector<8xf32>
    %59 = vector.multi_reduction <add>, %58, %cst_26 [1] : vector<8x8xf32> to vector<8xf32>
    %60 = vector.shape_cast %59 : vector<8xf32> to vector<8x1xf32>
    %cst_27 = arith.constant 1.000000e+00 : f32
    %61 = vector.broadcast %cst_27 : f32 to vector<8x1xf32>
    %62 = arith.divf %61, %60 : vector<8x1xf32>
    %63 = vector.broadcast %62 : vector<8x1xf32> to vector<8x8xf32>
    %64 = arith.mulf %58, %63 : vector<8x8xf32>
    %c0_28 = arith.constant 0 : index
    %c1 = arith.constant 1 : index
    %c0_29 = arith.constant 0 : index
    %c0_30 = arith.constant 0 : index
    %65 = vector.load %arg8[%c0_28, %c1, %c0_29, %c0_30] : memref<1x4x8x8xf32, #tpu.memory_space<vmem>>, vector<1x1x8x8xf32>
    %66 = vector.shape_cast %65 : vector<1x1x8x8xf32> to vector<8x8xf32>
    %67 = vector.shape_cast %64 : vector<8x8xf32> to vector<1x1x8x8xf32>
    tpu.vector_store %arg8[%c0_28, %c1, %c0_29, %c0_30], %67 {strides = array<i32>} : memref<1x4x8x8xf32, #tpu.memory_space<vmem>>, vector<1x1x8x8xf32>,
    %c0_31 = arith.constant 0 : index
    %c32 = arith.constant 32 : index
    %68 = vector.load %arg9[%c0_31, %c32] : memref<8x128xf32, #tpu.memory_space<vmem>>, vector<8x32xf32>
    %cst_32 = arith.constant dense<0.000000e+00> : vector<8x32xf32>
    %69 = tpu.matmul %64, %68, %cst_32 {dimension_numbers = #tpu.dot_dimension_numbers<[1], [0], [0], [1], [0, 0, 1, 1], [], []>} : vector<8x8xf32>, vector<8x32xf32>, vector<8x32xf32> -> vector<8x32xf32>
    %70 = vector.broadcast %12 : vector<1x32xf32> to vector<8x32xf32>
    %71 = arith.addf %69, %70 : vector<8x32xf32>
    %c0_33 = arith.constant 0 : index
    %c0_34 = arith.constant 0 : index
    %c32_35 = arith.constant 32 : index
    %72 = vector.load %arg7[%c0_33, %c0_34, %c32_35] : memref<1x8x128xf32, #tpu.memory_space<vmem>>, vector<1x8x32xf32>
    %73 = vector.shape_cast %72 : vector<1x8x32xf32> to vector<8x32xf32>
    %74 = vector.shape_cast %71 : vector<8x32xf32> to vector<1x8x32xf32>
    tpu.vector_store %arg7[%c0_33, %c0_34, %c32_35], %74 {strides = array<i32>} : memref<1x8x128xf32, #tpu.memory_space<vmem>>, vector<1x8x32xf32>,
    %75 = vector.extract_strided_slice %10 {offsets = [0, 2], sizes = [8, 1], strides = [1, 1]} : vector<8x4xf32> to vector<8x1xf32>
    %76 = vector.extract_strided_slice %11 {offsets = [2, 0], sizes = [1, 8], strides = [1, 1]} : vector<4x8xf32> to vector<1x8xf32>
    %77 = vector.broadcast %75 : vector<8x1xf32> to vector<8x8xf32>
    %78 = vector.broadcast %76 : vector<1x8xf32> to vector<8x8xf32>
    %79 = arith.addf %77, %78 : vector<8x8xf32>
    %cst_36 = arith.constant 2.000000e-01 : f32
    %80 = vector.broadcast %cst_36 : f32 to vector<8x8xf32>
    %81 = arith.mulf %80, %79 : vector<8x8xf32>
    %82 = arith.maximumf %79, %81 : vector<8x8xf32>
    %cst_37 = arith.constant -1.000000e+30 : f32
    %83 = vector.broadcast %cst_37 : f32 to vector<8x8xf32>
    %84 = arith.select %8, %83, %82 : vector<8x8xi1>, vector<8x8xf32>
    %cst_38 = arith.constant dense<0xFF800000> : vector<8xf32>
    %85 = vector.multi_reduction <maximumf>, %84, %cst_38 [1] : vector<8x8xf32> to vector<8xf32>
    %86 = vector.shape_cast %85 : vector<8xf32> to vector<8x1xf32>
    %87 = vector.broadcast %86 : vector<8x1xf32> to vector<8x8xf32>
    %88 = arith.subf %84, %87 : vector<8x8xf32>
    %89 = math.exp %88 : vector<8x8xf32>
    %cst_39 = arith.constant dense<0.000000e+00> : vector<8xf32>
    %90 = vector.multi_reduction <add>, %89, %cst_39 [1] : vector<8x8xf32> to vector<8xf32>
    %91 = vector.shape_cast %90 : vector<8xf32> to vector<8x1xf32>
    %cst_40 = arith.constant 1.000000e+00 : f32
    %92 = vector.broadcast %cst_40 : f32 to vector<8x1xf32>
    %93 = arith.divf %92, %91 : vector<8x1xf32>
    %94 = vector.broadcast %93 : vector<8x1xf32> to vector<8x8xf32>
    %95 = arith.mulf %89, %94 : vector<8x8xf32>
    %c0_41 = arith.constant 0 : index
    %c2 = arith.constant 2 : index
    %c0_42 = arith.constant 0 : index
    %c0_43 = arith.constant 0 : index
    %96 = vector.load %arg8[%c0_41, %c2, %c0_42, %c0_43] : memref<1x4x8x8xf32, #tpu.memory_space<vmem>>, vector<1x1x8x8xf32>
    %97 = vector.shape_cast %96 : vector<1x1x8x8xf32> to vector<8x8xf32>
    %98 = vector.shape_cast %95 : vector<8x8xf32> to vector<1x1x8x8xf32>
    tpu.vector_store %arg8[%c0_41, %c2, %c0_42, %c0_43], %98 {strides = array<i32>} : memref<1x4x8x8xf32, #tpu.memory_space<vmem>>, vector<1x1x8x8xf32>,
    %c0_44 = arith.constant 0 : index
    %c64 = arith.constant 64 : index
    %99 = vector.load %arg9[%c0_44, %c64] : memref<8x128xf32, #tpu.memory_space<vmem>>, vector<8x32xf32>
    %cst_45 = arith.constant dense<0.000000e+00> : vector<8x32xf32>
    %100 = tpu.matmul %95, %99, %cst_45 {dimension_numbers = #tpu.dot_dimension_numbers<[1], [0], [0], [1], [0, 0, 1, 1], [], []>} : vector<8x8xf32>, vector<8x32xf32>, vector<8x32xf32> -> vector<8x32xf32>
    %101 = vector.broadcast %12 : vector<1x32xf32> to vector<8x32xf32>
    %102 = arith.addf %100, %101 : vector<8x32xf32>
    %c0_46 = arith.constant 0 : index
    %c0_47 = arith.constant 0 : index
    %c64_48 = arith.constant 64 : index
    %103 = vector.load %arg7[%c0_46, %c0_47, %c64_48] : memref<1x8x128xf32, #tpu.memory_space<vmem>>, vector<1x8x32xf32>
    %104 = vector.shape_cast %103 : vector<1x8x32xf32> to vector<8x32xf32>
    %105 = vector.shape_cast %102 : vector<8x32xf32> to vector<1x8x32xf32>
    tpu.vector_store %arg7[%c0_46, %c0_47, %c64_48], %105 {strides = array<i32>} : memref<1x8x128xf32, #tpu.memory_space<vmem>>, vector<1x8x32xf32>,
    %106 = vector.extract_strided_slice %10 {offsets = [0, 3], sizes = [8, 1], strides = [1, 1]} : vector<8x4xf32> to vector<8x1xf32>
    %107 = vector.extract_strided_slice %11 {offsets = [3, 0], sizes = [1, 8], strides = [1, 1]} : vector<4x8xf32> to vector<1x8xf32>
    %108 = vector.broadcast %106 : vector<8x1xf32> to vector<8x8xf32>
    %109 = vector.broadcast %107 : vector<1x8xf32> to vector<8x8xf32>
    %110 = arith.addf %108, %109 : vector<8x8xf32>
    %cst_49 = arith.constant 2.000000e-01 : f32
    %111 = vector.broadcast %cst_49 : f32 to vector<8x8xf32>
    %112 = arith.mulf %111, %110 : vector<8x8xf32>
    %113 = arith.maximumf %110, %112 : vector<8x8xf32>
    %cst_50 = arith.constant -1.000000e+30 : f32
    %114 = vector.broadcast %cst_50 : f32 to vector<8x8xf32>
    %115 = arith.select %8, %114, %113 : vector<8x8xi1>, vector<8x8xf32>
    %cst_51 = arith.constant dense<0xFF800000> : vector<8xf32>
    %116 = vector.multi_reduction <maximumf>, %115, %cst_51 [1] : vector<8x8xf32> to vector<8xf32>
    %117 = vector.shape_cast %116 : vector<8xf32> to vector<8x1xf32>
    %118 = vector.broadcast %117 : vector<8x1xf32> to vector<8x8xf32>
    %119 = arith.subf %115, %118 : vector<8x8xf32>
    %120 = math.exp %119 : vector<8x8xf32>
    %cst_52 = arith.constant dense<0.000000e+00> : vector<8xf32>
    %121 = vector.multi_reduction <add>, %120, %cst_52 [1] : vector<8x8xf32> to vector<8xf32>
    %122 = vector.shape_cast %121 : vector<8xf32> to vector<8x1xf32>
    %cst_53 = arith.constant 1.000000e+00 : f32
    %123 = vector.broadcast %cst_53 : f32 to vector<8x1xf32>
    %124 = arith.divf %123, %122 : vector<8x1xf32>
    %125 = vector.broadcast %124 : vector<8x1xf32> to vector<8x8xf32>
    %126 = arith.mulf %120, %125 : vector<8x8xf32>
    %c0_54 = arith.constant 0 : index
    %c3 = arith.constant 3 : index
    %c0_55 = arith.constant 0 : index
    %c0_56 = arith.constant 0 : index
    %127 = vector.load %arg8[%c0_54, %c3, %c0_55, %c0_56] : memref<1x4x8x8xf32, #tpu.memory_space<vmem>>, vector<1x1x8x8xf32>
    %128 = vector.shape_cast %127 : vector<1x1x8x8xf32> to vector<8x8xf32>
    %129 = vector.shape_cast %126 : vector<8x8xf32> to vector<1x1x8x8xf32>
    tpu.vector_store %arg8[%c0_54, %c3, %c0_55, %c0_56], %129 {strides = array<i32>} : memref<1x4x8x8xf32, #tpu.memory_space<vmem>>, vector<1x1x8x8xf32>,
    %c0_57 = arith.constant 0 : index
    %c96 = arith.constant 96 : index
    %130 = vector.load %arg9[%c0_57, %c96] : memref<8x128xf32, #tpu.memory_space<vmem>>, vector<8x32xf32>
    %cst_58 = arith.constant dense<0.000000e+00> : vector<8x32xf32>
    %131 = tpu.matmul %126, %130, %cst_58 {dimension_numbers = #tpu.dot_dimension_numbers<[1], [0], [0], [1], [0, 0, 1, 1], [], []>} : vector<8x8xf32>, vector<8x32xf32>, vector<8x32xf32> -> vector<8x32xf32>
    %132 = vector.broadcast %12 : vector<1x32xf32> to vector<8x32xf32>
    %133 = arith.addf %131, %132 : vector<8x32xf32>
    %c0_59 = arith.constant 0 : index
    %c0_60 = arith.constant 0 : index
    %c96_61 = arith.constant 96 : index
    %134 = vector.load %arg7[%c0_59, %c0_60, %c96_61] : memref<1x8x128xf32, #tpu.memory_space<vmem>>, vector<1x8x32xf32>
    %135 = vector.shape_cast %134 : vector<1x8x32xf32> to vector<8x32xf32>
    %136 = vector.shape_cast %133 : vector<8x32xf32> to vector<1x8x32xf32>
    tpu.vector_store %arg7[%c0_59, %c0_60, %c96_61], %136 {strides = array<i32>} : memref<1x8x128xf32, #tpu.memory_space<vmem>>, vector<1x8x32xf32>,
    return
  }
  func.func @transform_0(%arg0: i32, %arg1: i32) -> (i32, i32, i32) {
    %c0_i32 = arith.constant 0 : i32
    %c0_i32_0 = arith.constant 0 : i32
    %c0_i32_1 = arith.constant 0 : i32
    return %arg0, %c0_i32, %c0_i32_0 : i32, i32, i32
  }
  func.func @transform_1(%arg0: i32, %arg1: i32) -> (i32, i32, i32) {
    %c0_i32 = arith.constant 0 : i32
    %c0_i32_0 = arith.constant 0 : i32
    return %arg0, %arg1, %c0_i32 : i32, i32, i32
  }
  func.func @transform_2(%arg0: i32, %arg1: i32) -> (i32, i32) {
    %c0_i32 = arith.constant 0 : i32
    %c0_i32_0 = arith.constant 0 : i32
    %c0_i32_1 = arith.constant 0 : i32
    return %c0_i32, %c0_i32_0 : i32, i32
  }
  func.func @transform_3(%arg0: i32, %arg1: i32) -> (i32, i32) {
    %c0_i32 = arith.constant 0 : i32
    %c0_i32_0 = arith.constant 0 : i32
    %c0_i32_1 = arith.constant 0 : i32
    return %c0_i32, %c0_i32_0 : i32, i32
  }
  func.func @transform_4(%arg0: i32, %arg1: i32) -> (i32, i32) {
    %c0_i32 = arith.constant 0 : i32
    %c0_i32_0 = arith.constant 0 : i32
    %c0_i32_1 = arith.constant 0 : i32
    return %c0_i32, %c0_i32_0 : i32, i32
  }
  func.func @transform_5(%arg0: i32, %arg1: i32) -> (i32, i32, i32) {
    %c0_i32 = arith.constant 0 : i32
    %c0_i32_0 = arith.constant 0 : i32
    return %arg0, %arg1, %c0_i32 : i32, i32, i32
  }
  func.func @transform_6(%arg0: i32, %arg1: i32) -> (i32, i32, i32, i32) {
    %c0_i32 = arith.constant 0 : i32
    %c0_i32_0 = arith.constant 0 : i32
    %c0_i32_1 = arith.constant 0 : i32
    return %arg0, %c0_i32, %arg1, %c0_i32_0 : i32, i32, i32, i32
  }
}

</mosaic_0001>

<bundles_post_ra>
// kernel: batch_multi_head_graph_attention.1
= control target key start
LH: loop header
LB: loop body
LE: loop exit
PB: predicated region body
PF: predicated region fallthrough
CT: control target
= control target key end

     0   :  { %12 = vsyncpa [#allocation6], 0  ;;  %s1718_s0 = inlined_call_operand.vmem [shape: f32[2,8,16], index: 0, kind: input, shape index: {}]   ;;  %s1719_s1 = inlined_call_operand.vmem [shape: f32[2,8,8], index: 1, kind: input, shape index: {}]   ;;  %s1720_s2 = inlined_call_operand.vmem [shape: f32[16,128], index: 2, kind: input, shape index: {}]   ;;  %s1721_s3 = inlined_call_operand.vmem [shape: f32[128,8], index: 3, kind: input, shape index: {}]   ;;  %s1722_s4 = inlined_call_operand.vmem [shape: f32[1,32], index: 4, kind: input, shape index: {}]   ;;  %s1723_s5 = inlined_call_operand.vmem [shape: f32[2,8,128], index: 5, kind: output, shape index: {0}]   ;;  %s1724_s6 = inlined_call_operand.hbm [shape: f32[2,4,8,8], index: 6, kind: output, shape index: {1}]  }
   0x1   :  { %14 = vsyncpa [#allocation6 + $0x1], 0  ;;  %s1469_s21 = smov 0   ;;  %s1471_s22 = smov 0  }
   0x2   :  { %s1473_s23 = smov 0   ;;  %s1475_s24 = smov 0  }
   0x3   :  { %s1477_s25 = smov 0   ;;  %s1479_s26 = smov 0  }
   0x4 LB: > { %s1108_s27 = sadd.s32 4294967295, %s1418_s26   ;;  %s1109_s28 = sadd.s32 4294967294, %s1418_s26   ;;  %s1418_s26 = sphi %s1479_s26, %s20_s26   ;;  %s1414_s25 = sphi %s1477_s25, %s1735_s25   ;;  %s1410_s24 = sphi %s1475_s24, %s1734_s24   ;;  %s1406_s23 = sphi %s1473_s23, %s1733_s23   ;;  %s1402_s22 = sphi %s1471_s22, %s1732_s22   ;;  %s1398_s21 = sphi %s1469_s21, %s1731_s21  }
   0x5   : > { %s32_s29 = sadd.s32 1, %s1414_s25  ;;  %s186_s30 = sadd.s32 1, %s1406_s23 }
   0x6   : > { %p34_p0 = scmp.ge.s32.totalorder %s32_s29, 2  ;;  %p196_p1 = scmp.ne.s32.totalorder %s1406_s23, %s1402_s22 }
   0x7   : > { %p197_p2 = scmp.eq.s32.totalorder %s1108_s27, 1  ;;  %p202_p3 = scmp.ne.s32.totalorder %s1402_s22, %s1398_s21 }
   0x8   : > { %s1737_s29 = smov (%p34_p0, %s32_s29), 0  ;;  %p203_p5 = scmp.eq.s32.totalorder %s1109_s28, 1 }
   0x9   : > { %p1509_p4 = por %p197_p2, %p196_p1  ;;  %s181_s8 = ssub.s32 %s1414_s25, %s1737_s29 }
   0xa   : > { %p1112_p6 = scmp.ge.s32.totalorder %s1418_s26, 1  ;;  %p184_p7 = scmp.eq.s32.totalorder %s181_s8, 0 }
   0xb   : > { %p1516_p8 = por %p203_p5, %p202_p3  ;;  %p247_p9 = scmp.lt.s32.totalorder %s1418_s26, 3 }
   0xc   : > { %s1522_s10 = scalar_select %p184_p7, %s1406_s23, %s186_s30  }
   0xd   : > { %p248_p10 = pnand %p1112_p6, %p247_p9 }
   0xe   : > { %v313_v0 = vld [vmem:[%s1720_s2] sm:$0xff] (!%p248_p10)  ;;  %v314_v1 = vld [vmem:[%s1720_s2 + $0x8] sm:$0xff] (!%p248_p10)  ;;  %p290_p11 = scmp.lt.s32.totalorder (!%p248_p10), %s1410_s24, 1  ;;  %v1420_v2 = vmov (!%p248_p10), 0.0|0.0   ;;  %vm1421_vm0 = vmmov (!%p248_p10), 0   ;;  %v1422_v4 = vmov (!%p248_p10), 0.0   ;;  %v529_v42 = vlaneseq (!%p248_p10) }
   0xf   : > { %251 = sbr.rel (%p248_p10) target bundleno = 1390 (0x56e), region = 40  ;;  %1222 = vmatprep.subr.bf16.mxu0 (!%p248_p10), %v1420_v2  ;;  %v1223_v3 = vpack.c.bf16 (!%p248_p10), %v314_v1, %v313_v0  ;;  %1164 = vmatprep.mubr.msk.f32.mxu0 (!%p248_p10), %vm1421_vm0, %v1422_v4  ;;  %v391_v5 = vld [vmem:[%s1721_s3] sm:$0xff] (!%p248_p10)  ;;  %v392_v6 = vld [vmem:[%s1721_s3 + $0x8] sm:$0xff] (!%p248_p10)  ;;  %v393_v7 = vld [vmem:[%s1721_s3 + $0x10] sm:$0xff] (!%p248_p10)  ;;  %vm315_vm1 = vcmask (!%p248_p10), 130048   ;;  %v1423_v33 = vmov (!%p248_p10), 1  }
  0x10   : > { %1225 = vmatprep.subr.bf16.mxu1 (!%p248_p10), %v1420_v2  ;;  %v1226_v8 = vpack.c.bf16 (!%p248_p10), %v392_v6, %v391_v5  ;;  %v394_v9 = vld [vmem:[%s1721_s3 + $0x18] sm:$0xff] (!%p248_p10)  ;;  %1199 = vmatprep.mubr.msk.f32.mxu1 (!%p248_p10), %vm1421_vm0, %v1422_v4  ;;  %v395_v11 = vld [vmem:[%s1721_s3 + $0x20] sm:$0xff] (!%p248_p10)  ;;  %v396_v12 = vld [vmem:[%s1721_s3 + $0x28] sm:$0xff] (!%p248_p10)  ;;  %v1424_v34 = vmov (!%p248_p10), 0   ;;  %vm477_vm2 = vcmask (!%p248_p10), 31744   ;;  %s1425_s12 = smov (!%p248_p10), 124  }
  0x11   : > { %1224 = vmatpush3.bf16.msra.mxu0 (!%p248_p10), %v1223_v3  ;;  %v1229_v10 = vpack.c.bf16 (!%p248_p10), %v394_v9, %v393_v7  ;;  %v1232_v14 = vpack.c.bf16 (!%p248_p10), %v396_v12, %v395_v11  ;;  %v397_v15 = vld [vmem:[%s1721_s3 + $0x30] sm:$0xff] (!%p248_p10)  ;;  %v398_v16 = vld [vmem:[%s1721_s3 + $0x38] sm:$0xff] (!%p248_p10)  ;;  %v399_v18 = vld [vmem:[%s1721_s3 + $0x40] sm:$0xff] (!%p248_p10)  ;;  %1318 = vset.pattern.permute.xlu1 (!%p248_p10), %v1423_v33  ;;  %v1426_v38 = vmov (!%p248_p10), 2   ;;  %v1427_v39 = vmov (!%p248_p10), 3   ;;  %s1726_s16 = smov (!%p248_p10), 64  }
  0x12   : > { %1227 = vmatpush3.bf16.msra.mxu1 (!%p248_p10), %v1226_v8  ;;  %1202 = vmatprep.subr.mxu0 (!%p248_p10), %v1422_v4  ;;  %v1235_v17 = vpack.c.bf16 (!%p248_p10), %v398_v16, %v397_v15  ;;  %v400_v19 = vld [vmem:[%s1721_s3 + $0x48] sm:$0xff] (!%p248_p10)  ;;  %v401_v21 = vld [vmem:[%s1721_s3 + $0x50] sm:$0xff] (!%p248_p10)  ;;  %v402_v22 = vld [vmem:[%s1721_s3 + $0x58] sm:$0xff] (!%p248_p10)  ;;  %vm515_vm3 = vcmask (!%p248_p10), 60416   ;;  %v530_v45 = vshrl.u32 (!%p248_p10), %v529_v42, 7  ;;  %vm537_vm5 = vcmask (!%p248_p10), 64512  }
  0x13   : > { %1228 = vmatprep.subr.bf16.mxu1 (!%p248_p10), %v1420_v2  ;;  %v1238_v20 = vpack.c.bf16 (!%p248_p10), %v400_v19, %v399_v18  ;;  %v1241_v23 = vpack.c.bf16 (!%p248_p10), %v402_v22, %v401_v21  ;;  %v403_v24 = vld [vmem:[%s1721_s3 + $0x60] sm:$0xff] (!%p248_p10)  ;;  %v404_v25 = vld [vmem:[%s1721_s3 + $0x68] sm:$0xff] (!%p248_p10)  ;;  %v405_v27 = vld [vmem:[%s1721_s3 + $0x70] sm:$0xff] (!%p248_p10)  ;;  %1317 = vset.pattern.permute.xlu0 (!%p248_p10), %v1424_v34  ;;  %s1725_s17 = smov (!%p248_p10), 96   ;;  %s1430_s18 = smov (!%p248_p10), 32   ;;  %vm631_vm6 = vcmask (!%p248_p10), 261120  }
  0x14   : > { %v1244_v26 = vpack.c.bf16 (!%p248_p10), %v404_v25, %v403_v24  ;;  %v406_v28 = vld [vmem:[%s1721_s3 + $0x78] sm:$0xff] (!%p248_p10)  ;;  %v639_v47 = vsub.s32 (!%p248_p10), 1, %v530_v45  ;;  %v531_v48 = vsub.s32 (!%p248_p10), 0, %v530_v45  ;;  %v749_v49 = vsub.s32 (!%p248_p10), 2, %v530_v45  ;;  %s287_s19 = sand.u32 (!%p248_p10), 1, %s1402_s22   ;;  %s1131_s14 = sshll.u32 (!%p248_p10), %s1410_s24, 9 }
  0x15   : > { %v1247_v29 = vpack.c.bf16 (!%p248_p10), %v406_v28, %v405_v27  ;;  %v859_v50 = vsub.s32 (!%p248_p10), 3, %v530_v45  ;;  %s1113_s20 = sshll.u32 (!%p248_p10), %s287_s19, 5 }
  0x16   : > { %s291_s27 = scalar_select %p290_p11, %s1410_s24, 1  ;;  %1230 = vmatpush3.bf16.msra.mxu1 %v1229_v10 }
  0x17   : > { %1231 = vmatprep.subr.bf16.mxu1 %v1420_v2  ;;  %s1431_s24 = smov [#allocation5]  }
  0x18   : > { %s1548_s8 = sshll.u32 %s291_s27, 3  ;;  %s1623_s27 = scalar_lea.vmem [#allocation5], %s1113_s20 }
  0x19   : > { %s293_s13 = scalar_lea.vmem %s1718_s0, %s1548_s8  ;;  %s300_s15 = scalar_lea.vmem %s1719_s1, %s1548_s8 }
  0x1a   : > { %v312_v13 = vld [vmem:[%s293_s13] sm:$0xff]  ;;  %1233 = vmatpush3.bf16.msra.mxu1 %v1232_v14  ;;  %s1652_s13 = scalar_lea.vmem %s1723_s5, %s1548_s8  ;;  %s1666_s8 = scalar_lea.sflag [#allocation6], %s287_s19 }
  0x1b   : > { %1165 = vmatmul.mubr.msk.f32.vlgmr.msra.gmra.mrb[0].mxu0 %vm315_vm1, %v312_v13  ;;  %1234 = vmatprep.subr.bf16.mxu1 %v1420_v2  ;;  %v518_v57 = vld [vmem:[%s300_s15] sm:$0xff]  ;;  %s988_s15 = sshll.u32 %s1623_s27, 4  ;;  %s1662_s15 = int_to_ptr.vmem [resolvable:$true] %s988_s15 }
  0x1c   : > { %1204 = vmatprep.mubr.msk.f32.mxu0 %vm1421_vm0, %v1422_v4  ;;  %vm519_vm4 = vcmp.ne.f32.partialorder %v518_v57, 1.0  ;;  %s1340_s28 = scalar_lea.vmem %s1662_s15, 512 }
  0x1d   : > { %p1341_p12 = scmp.ne.s32.totalorder %s1662_s15, %s1340_s28 }
  0x1e   : > { %1236 = vmatpush3.bf16.msra.mxu1 %v1235_v17 }
  0x1f   : > { %1237 = vmatprep.subr.bf16.mxu1 %v1420_v2  ;;  %p1342_p13 = pnand %p1341_p12, %p1509_p4 }
  0x21   : > { %p1343_p0 = pneg %p1342_p13 }
  0x22   : > { %1239 = vmatpush3.bf16.msra.mxu1 %v1238_v20 }
  0x23   : > { %1240 = vmatprep.subr.bf16.mxu1 %v1420_v2 }
  0x26   : > { %1242 = vmatpush3.bf16.msra.mxu1 %v1241_v23 }
  0x27   : > { %1243 = vmatprep.subr.bf16.mxu1 %v1420_v2 }
  0x2a   : > { %1245 = vmatpush3.bf16.msra.mxu1 %v1244_v26 }
  0x2b   : > { %1246 = vmatprep.subr.bf16.mxu1 %v1420_v2 }
  0x2e   : > { %1248 = vmatpush3.bf16.msra.mxu1 %v1247_v29 }
  0xee   : > { %v1593_v30 = vpop.f32.mrb[0].mxu0 }
  0xef   : > { %1322 = vtanh.f32 %v1593_v30  ;;  %v1166_v31 = vpop.f32.mrb[1].mxu0  ;;  %1203 = vmatpush3.msra.mxu0 %v1593_v30 }
  0xf0   : > { %1207 = vmatprep.subr.mxu0 %v1422_v4 }
  0xf9   : > { %v1323_v32 = vpop.eup %1322 }
  0xfa   : > { %1200 = vmatmul.mubr.f32.vlgmr.msra.gmra.mrb[0].mxu1 %v1323_v32 }
 0x1cd   : > { %v473_v35 = vpop.f32.mrb[0].mxu1 }
 0x1ce   : > { %478 = vst.msk [vmem:[#allocation3] sm:$0xff] %vm477_vm2, %v473_v35  ;;  %480 = vrot.lane.b32.xlu0 %v473_v35, %s1425_s12  ;;  %v1201_v36 = vpop.f32.mrb[1].mxu1 }
 0x1d5   : > { %v521_v37 = vld [vmem:[#allocation3] sm:$0xff] }
 0x1d6   : > { %634 = vperm.xlu1 %1318, %v521_v37   ;;  %526 = vperm.xlu0 %1317, %v521_v37  }
 0x1da   : > { %1319 = vset.pattern.permute.xlu1 %v1426_v38 }
 0x1db   : > { %744 = vperm.xlu1 %1319, %v521_v37  }
 0x1df   : > { %1320 = vset.pattern.permute.xlu1 %v1427_v39 }
 0x1e0   : > { %854 = vperm.xlu1 %1320, %v521_v37  }
 0x240   : > { %v481_v40 = vpop.permute.xlu0 %480 }
 0x241   : > { %483 = vxpose.xlu0.b32.start.end [1/1] (short) (narrow) %v481_v40, 8 }
 0x255   : > { %v527_v41 = vpop.permute.xlu0 %526  ;;  %v635_v43 = vpop.permute.xlu1 %634 }
 0x25a   : > { %v745_v46 = vpop.permute.xlu1 %744 }
 0x25f   : > { %v855_v56 = vpop.permute.xlu1 %854 }
 0x26a   : > { %1321 = vset.pattern.permute.xlu0 %v1427_v39 }
 0x2c1   : > { %v499_v44 = vpop.trf.xlu0 }
 0x2c2   : > { %516 = vst.msk [vmem:[#allocation4] sm:$0xf] %vm515_vm3, %v499_v44 }
 0x2c9   : > { %v522_v51 = vld [vmem:[#allocation4] sm:$0xf] }
 0x2ca   : > { %v640_v52 = vrot.slane %v522_v51, %v639_v47  ;;  %v532_v53 = vrot.slane %v522_v51, %v531_v48  ;;  %v750_v54 = vrot.slane %v522_v51, %v749_v49  ;;  %v860_v55 = vrot.slane %v522_v51, %v859_v50  ;;  %v1118_v50 = vld [vmem:[%s1722_s4] ss:$0 sm:$0xff] }
 0x2cc   : > { %v641_v58 = vadd.f32 %v640_v52, %v635_v43  ;;  %v533_v59 = vadd.f32 %v532_v53, %v527_v41  ;;  %v751_v60 = vadd.f32 %v750_v54, %v745_v46  ;;  %v861_v61 = vadd.f32 %v860_v55, %v855_v56 }
 0x2ce   : > { %v642_v62 = vmul.f32 0.2, %v641_v58  ;;  %v534_v63 = vmul.f32 0.2, %v533_v59  ;;  %v752_v0 = vmul.f32 0.2, %v751_v60 }
 0x2cf   : > { %v862_v5 = vmul.f32 0.2, %v861_v61 }
 0x2d0   : > { %v643_v1 = vmax.f32 %v641_v58, %v642_v62  ;;  %v535_v2 = vmax.f32 %v533_v59, %v534_v63  ;;  %v753_v3 = vmax.f32 %v751_v60, %v752_v0 }
 0x2d1   : > { %v863_v11 = vmax.f32 %v861_v61, %v862_v5 }
 0x2d2   : > { %v644_v6 = vsel %vm519_vm4, -1e+30, %v643_v1  ;;  %v536_v7 = vsel %vm519_vm4, -1e+30, %v535_v2  ;;  %v754_v10 = vsel %vm519_vm4, -1e+30, %v753_v3 }
 0x2d3   : > { %v645_v8 = vsel %vm537_vm5, %v644_v6, -inf  ;;  %v538_v9 = vsel %vm537_vm5, %v536_v7, -inf  ;;  %v755_v12 = vsel %vm537_vm5, %v754_v10, -inf  ;;  %v864_v13 = vsel %vm519_vm4, -1e+30, %v863_v11 }
 0x2d4   : > { %646 = vmax.xlane.f32.xlu0 %v645_v8  ;;  %539 = vmax.xlane.f32.xlu1 %v538_v9  ;;  %v865_v14 = vsel %vm537_vm5, %v864_v13, -inf }
 0x2d8   : > { %756 = vmax.xlane.f32.xlu1 %v755_v12 }
 0x2dc   : > { %866 = vmax.xlane.f32.xlu1 %v865_v14 }
 0x2ea   : > { %771 = vrot.lane.b32.xlu0 %v1593_v30, %s1726_s16  ;;  %s1659_s16 = scalar_lea.hbm %s1724_s6, %s1131_s14 }
 0x2ed   : > { %661 = vrot.lane.b32.xlu1 %v1593_v30, %s1725_s17  ;;  %s1344_s17 = sshll.u32 %s1431_s24, 4  ;;  %s1345_s17 = int_to_ptr.vmem [resolvable:$false] %s1344_s17 }
 0x2ee   : > { %p1347_p1 = scmp.lt.s32.totalorder %s1662_s15, %s1345_s17 }
 0x361   : > { %v647_v15 = vpop.xlane.xlu0 %646  ;;  %v540_v16 = vpop.xlane.xlu1 %539 }
 0x362   : > { %v648_v17 = vsub.f32 %v644_v6, %v647_v15  ;;  %v541_v18 = vsub.f32 %v536_v7, %v540_v16 }
 0x364   : > { %v542_v19 = vmul.f32 1.442695, %v541_v18  ;;  %v649_v20 = vmul.f32 1.442695, %v648_v17 }
 0x365   : > { %v757_v21 = vpop.xlane.xlu1 %756  ;;  %v772_v44 = vpop.permute.xlu0 %771 }
 0x366   : > { %v758_v22 = vsub.f32 %v754_v10, %v757_v21  ;;  %1324 = vpow2.f32 %v542_v19 }
 0x367   : > { %1326 = vpow2.f32 %v649_v20 }
 0x368   : > { %v759_v23 = vmul.f32 1.442695, %v758_v22 }
 0x369   : > { %v867_v24 = vpop.xlane.xlu1 %866 }
 0x36a   : > { %v868_v25 = vsub.f32 %v864_v13, %v867_v24  ;;  %1328 = vpow2.f32 %v759_v23 }
 0x36c   : > { %v869_v26 = vmul.f32 1.442695, %v868_v25 }
 0x36d   : > { %v662_v36 = vpop.permute.xlu1 %661 }
 0x36e   : > { %1330 = vpow2.f32 %v869_v26 }
 0x370   : > { %v1325_v27 = vpop.eup %1324 }
 0x371   : > { %v544_v28 = vsel %vm537_vm5, %v1325_v27, 0.0  ;;  %v1327_v29 = vpop.eup %1326 }
 0x372   : > { %545 = vadd.xlane.f32.xlu1 %v544_v28  ;;  %v651_v31 = vsel %vm537_vm5, %v1327_v29, 0.0 }
 0x374   : > { %v1329_v32 = vpop.eup %1328 }
 0x375   : > { %v761_v33 = vsel %vm537_vm5, %v1329_v32, 0.0 }
 0x376   : > { %652 = vadd.xlane.f32.xlu1 %v651_v31 }
 0x378   : > { %v1331_v34 = vpop.eup %1330 }
 0x379   : > { %v871_v35 = vsel %vm537_vm5, %v1331_v34, 0.0 }
 0x37a   : > { %762 = vadd.xlane.f32.xlu1 %v761_v33 }
 0x37e   : > { %872 = vadd.xlane.f32.xlu1 %v871_v35 }
 0x38f   : > { %881 = vrot.lane.b32.xlu1 %v1593_v30, %s1430_s18 }
 0x3ff   : > { %v546_v37 = vpop.xlane.xlu1 %545 }
 0x400   : > { %1332 = vrcp.f32 %v546_v37 }
 0x403   : > { %v653_v38 = vpop.xlane.xlu1 %652 }
 0x404   : > { %1334 = vrcp.f32 %v653_v38 }
 0x407   : > { %v763_v39 = vpop.xlane.xlu1 %762 }
 0x408   : > { %1336 = vrcp.f32 %v763_v39 }
 0x40a   : > { %v1333_v40 = vpop.eup %1332 }
 0x40b   : > { %v549_v41 = vmul.f32 %v1333_v40, %v1325_v27  ;;  %v873_v42 = vpop.xlane.xlu1 %872 }
 0x40c   : > { %1338 = vrcp.f32 %v873_v42 }
 0x40d   : > { %550 = vst.msk [vmem:[%s1623_s27] sm:$0xff] %vm537_vm5, %v549_v41  ;;  %1205 = vmatmul.mubr.msk.f32.vlgmr.msra.gmra.mrb[2].mxu0 %vm537_vm5, %v549_v41 }
 0x40e   : > { %v1335_v30 = vpop.eup %1334  ;;  %1208 = vmatpush3.msra.mxu0 %v662_v36  ;;  %1209 = vmatprep.mubr.msk.f32.mxu0 %vm1421_vm0, %v1422_v4 }
 0x40f   : > { %v656_v43 = vmul.f32 %v1335_v30, %v1327_v29  ;;  %1212 = vmatprep.subr.mxu0 %v1422_v4  ;;  %v882_v47 = vpop.permute.xlu1 %881 }
 0x411   : > { %1120 = vst.msk [vmem:[%s1623_s27 + $0x8] sm:$0xff] %vm537_vm5, %v656_v43  ;;  %1210 = vmatmul.mubr.msk.f32.vlgmr.msra.gmra.mrb[4].mxu0 %vm537_vm5, %v656_v43 }
 0x412   : > { %v1337_v45 = vpop.eup %1336  ;;  %1213 = vmatpush3.msra.mxu0 %v772_v44  ;;  %1214 = vmatprep.mubr.msk.f32.mxu0 %vm1421_vm0, %v1422_v4 }
 0x413   : > { %v766_v46 = vmul.f32 %v1337_v45, %v1329_v32  ;;  %1217 = vmatprep.subr.mxu0 %v1422_v4 }
 0x415   : > { %1122 = vst.msk [vmem:[%s1623_s27 + $0x10] sm:$0xff] %vm537_vm5, %v766_v46  ;;  %1215 = vmatmul.mubr.msk.f32.vlgmr.msra.gmra.mrb[6].mxu0 %vm537_vm5, %v766_v46 }
 0x416   : > { %v1339_v48 = vpop.eup %1338  ;;  %1218 = vmatpush3.msra.mxu0 %v882_v47  ;;  %1219 = vmatprep.mubr.msk.f32.mxu0 %vm1421_vm0, %v1422_v4 }
 0x417   : > { %v876_v49 = vmul.f32 %v1339_v48, %v1331_v34 }
 0x419   : > { %1124 = vst.msk [vmem:[%s1623_s27 + $0x18] sm:$0xff] %vm537_vm5, %v876_v49  ;;  %1220 = vmatmul.mubr.msk.f32.vlgmr.msra.gmra.mrb[8].mxu0 %vm537_vm5, %v876_v49  ;;  %s1346_s27 = scalar_lea.vmem %s1345_s17, 1024 }
 0x41a   : > { %p1348_p2 = scmp.lt.s32.totalorder %s1346_s27, %s1340_s28 }
 0x41c   : > { %p1349_p3 = por %p1348_p2, %p1347_p1 }
 0x41e   : > { %p1350_p5 = pnand %p1349_p3, %p1343_p0 }
 0x4e0   : > { %v627_v51 = vpop.f32.mrb[2].mxu0 }
 0x4e1   : > { %v628_v4 = vadd.f32 %v1118_v50, %v627_v51  ;;  %v1206_v52 = vpop.f32.mrb[3].mxu0 }
 0x4e3   : > { %632 = vst.msk [vmem:[%s1652_s13] sm:$0xff] %vm631_vm6, %v628_v4 }
 0x4e4   : > { %v733_v53 = vpop.f32.mrb[4].mxu0 }
 0x4e5   : > { %v734_v54 = vadd.f32 %v1118_v50, %v733_v53  ;;  %v1211_v55 = vpop.f32.mrb[5].mxu0 }
 0x4e6   : > { %1353 = shalt.err (!%p1350_p5)
}
 0x4e7   : > { %s1354_s19 = scalar_lea.hbm %s1659_s16, 512  ;;  %s1358_s12 = scalar_lea.hbm %s1724_s6, 1024 }
 0x4e8   : > { %p1355_p6 = scmp.ne.s32.totalorder %s1659_s16, %s1354_s19  ;;  %p1359_p10 = scmp.lt.u32.totalorder %s1659_s16, %s1724_s6 }
 0x4e9   : > { %p1360_p11 = scmp.lt.u32.totalorder %s1358_s12, %s1354_s19  ;;  %p1362_p13 = scmp.lt.u32.totalorder %s1354_s19, %s1659_s16 }
 0x4ea   : > { %p1356_p7 = pnand %p1355_p6, %p1509_p4 }
 0x4eb   : > { %p1361_p12 = por %p1360_p11, %p1359_p10 }
 0x4ec   : > { %p1357_p9 = pneg %p1356_p7 }
 0x4ed   : > { %p1363_p0 = por %p1362_p13, %p1361_p12 }
 0x4ef   : > { %p1364_p1 = pnand %p1363_p0, %p1357_p9 }
 0x4f1   : > { %1367 = shalt.err (!%p1364_p1)
}
 0x4f2   : > { %s1432_s28 = smov 128   ;;  %s1433_s24 = smov 8   ;;  %738 = vrot.lane.b32.xlu1 %v734_v54, %s1430_s18  ;;  %v843_v56 = vpop.f32.mrb[6].mxu0  ;;  %vm741_vm7 = vcmask 523520   ;;  %vm851_vm8 = vcmask 785920   ;;  %vm961_vm9 = vcmask 1048320  }
 0x4f3   : > { %1249 = dma.vmem_to_hbm [thread:$0]  (%p1509_p4), %s1662_s15, 512, %s1659_s16, %s1666_s8, %s1432_s28, %s1432_s28, %s1433_s24   ;;  %v844_v57 = vadd.f32 %v1118_v50, %v843_v56  ;;  %v1216_v58 = vpop.f32.mrb[7].mxu0 }
 0x4f4   : > { %s1729_s17 = smov 64   ;;  %v953_v59 = vpop.f32.mrb[8].mxu0  ;;  %s1730_s27 = smov 96  }
 0x4f5   : > { %v954_v60 = vadd.f32 %v1118_v50, %v953_v59  ;;  %v1221_v61 = vpop.f32.mrb[9].mxu0 }
 0x4f6   : > { %848 = vrot.lane.b32.xlu1 %v844_v57, %s1729_s17 }
 0x4fa   : > { %958 = vrot.lane.b32.xlu1 %v954_v60, %s1730_s27 }
 0x564   : > { %v739_v62 = vpop.permute.xlu1 %738 }
 0x565   : > { %742 = vst.msk [vmem:[%s1652_s13] sm:$0xff] %vm741_vm7, %v739_v62 }
 0x568   : > { %v849_v63 = vpop.permute.xlu1 %848 }
 0x569   : > { %852 = vst.msk [vmem:[%s1652_s13] sm:$0xff] %vm851_vm8, %v849_v63 }
 0x56c   : > { %v959_v0 = vpop.permute.xlu1 %958 }
 0x56d   : > { %962 = vst.msk [vmem:[%s1652_s13] sm:$0xff] %vm961_vm9, %v959_v0 }
 0x56e PF: > { %p1255_p4 = scmp.ge.s32.totalorder %s1418_s26, 2  ;;  %s1013_s7 = sand.u32 1, %s1398_s21  }
 0x56f   : > { %s1014_s16 = scalar_lea.sflag [#allocation6], %s1013_s7 }
 0x570   : > { %p1252_p2 = pnand %p1255_p4, %p1516_p8 }
 0x572   : > { %1393 = dma.done.wait (!%p1252_p2), %s1014_s16, 512  }
 0x573   : > { %1395 = vsyncadd (!%p1252_p2), %s1014_s16, 4294966784  ;;  %s20_s26 = sadd.s32 1, %s1418_s26   ;;  %s1731_s21 = smov %s1402_s22 }
 0x574   : > { %p17_p3 = scmp.ge.s32.totalorder %s20_s26, 4   ;;  %s1732_s22 = smov %s1406_s23 }
 0x575   : > { %s1733_s23 = smov %s1522_s10  ;;  %s1734_s24 = smov %s1414_s25 }
 0x576   : > { %s1735_s25 = smov %s1737_s29  ;;  %19 = sbr.rel (!%p17_p3) target bundleno = 4 (0x4), region = 98 }
 0x57d   :  { %1019 = vsyncpa [#allocation6], 1 }
 0x57e   :  { %1021 = vsyncpa [#allocation6 + $0x1], 1 }

</bundles_post_ra>
